<compile_context>
chip_gen: v5e
topology: v5e:2x2
jax: 0.10.0
libtpu: 0.0.40
codegen_flags: <defaults>
</compile_context>

<pallas_src>
import functools

import jax
import jax.numpy as jnp
from jax.experimental import pallas as pl
from jax.experimental.pallas import tpu as pltpu

EPS = 1e-5
NEG_SLOPE = 0.1


def _leaky(x):
    return jnp.where(x >= 0, x, NEG_SLOPE * x)


def _round_up(a, b):
    return (a + b - 1) // b * b


def _res_block_kernel(x_ref, w1_ref, w2_ref, g1_ref, b1_ref, g2_ref, b2_ref,
                      mm1_ref, mval_ref, mp1_ref, o_ref, *, inv_cnt, pad_cnt):
    """Whole residual block on a lane-dense (C, N*L_pad) slab.

    x_ref   : (Cin_p,  NLp)        input, exactly zero in padded rows/columns
    w1_ref  : (3, Hid_p, Cin_p)    per-tap conv1 weights (tap k pairs with x[l-1+k])
    w2_ref  : (3, Cout_p, Hid_p)   per-tap conv2 weights
    g*/b*   : (C_p, 1)             BatchNorm affine params (zero in padded rows)
    mm1/mp1 : (1, NLp)             masks zeroing the per-sample l==0 / l==L-1 shifted
                                   columns and all padded columns
    mval    : (1, NLp)             mask zeroing padded columns only
    o_ref   : (Cout_p, NLp)        output (padded rows/columns sliced off in the wrapper)
    """
    x = x_ref[...]
    mm1 = mm1_ref[...]
    mval = mval_ref[...]
    mp1 = mp1_ref[...]
    nlp = x.shape[1]

    def conv3(src, w_ref):
        # k=3, stride=1, pad=1 conv1d as three accumulated MXU dots (no 3C-wide concat).
        # Shifted copies use the XLU roll slot; shift is always non-negative (cyclic), and
        # one boundary mask per shift zeroes sample-boundary / padded columns so sample
        # edges see zero padding and padded columns stay exactly zero.
        cd = w_ref.dtype
        s_m1 = pltpu.roll(src, shift=1, axis=1) * mm1          # col j holds src[:, j-1]
        s_p1 = pltpu.roll(src, shift=nlp - 1, axis=1) * mp1    # col j holds src[:, j+1]
        h = jnp.dot(w_ref[1], src.astype(cd), preferred_element_type=jnp.float32)
        h = h + jnp.dot(w_ref[0], s_m1.astype(cd), preferred_element_type=jnp.float32)
        h = h + jnp.dot(w_ref[2], s_p1.astype(cd), preferred_element_type=jnp.float32)
        return h

    def batchnorm(h, g, b):
        # Training-mode BN over (N, L), biased variance, two-pass (centered) for stability.
        # h is exactly zero at padded columns, so the mean sum is exact; the variance sum
        # sees d == -m there, corrected in closed form by pad_cnt * m^2 (no extra slab mul).
        s1 = jnp.sum(h, axis=1, keepdims=True)
        m = s1 * inv_cnt
        d = h - m
        v = (jnp.sum(d * d, axis=1, keepdims=True) - pad_cnt * (m * m)) * inv_cnt
        scale = jax.lax.rsqrt(v + EPS) * g
        return d * scale + b

    # --- cbl1: conv -> BN -> LeakyReLU.  Re-zero padded columns so conv2 / BN2 stats stay exact.
    a1 = _leaky(batchnorm(conv3(x, w1_ref), g1_ref[...], b1_ref[...])) * mval
    # --- cbl2: conv -> BN, then residual add + final LeakyReLU.
    y = batchnorm(conv3(a1, w2_ref), g2_ref[...], b2_ref[...]) + x
    o_ref[...] = _leaky(y)


def res_basic_block(x, w1, w2, g1, b1, g2, b2, *, use_bf16=None):
    """x: (N, Cin, L) f32; w1: (Hid, Cin, 3); w2: (Cout, Hid, 3); g*/b*: (C,)."""
    N, cin, L = x.shape
    hid = w1.shape[0]
    cout = w2.shape[0]
    assert w1.shape == (hid, cin, 3) and w2.shape == (cout, hid, 3), "expected k=3 conv weights"
    assert cout == cin, "residual add requires in_ch == out_ch (and stride == 1)"

    # bf16 matmul operands only when the MXU is plausibly the binding unit; at small C the
    # kernel is VPU-bound and f32 keeps the result bit-accurate vs the reference.
    if use_bf16 is None:
        use_bf16 = min(cin, hid, cout) >= 128
    wdtype = jnp.bfloat16 if use_bf16 else jnp.float32

    NL = N * L
    NLp = _round_up(NL, 128)                       # lane-dense: unmasked stores, full lanes
    cin_p, hid_p, cout_p = (_round_up(c, 8) for c in (cin, hid, cout))
    f32 = jnp.float32

    # (N, C, L) -> (C, N*L): channels on sublanes, batch*length on lanes; zero-pad both dims.
    x2 = jnp.transpose(x, (1, 0, 2)).reshape(cin, NL).astype(f32)
    x2 = jnp.pad(x2, ((0, cin_p - cin), (0, NLp - NL)))

    def split_w(w, co_p, ci_p):
        # (Cout, Cin, 3) -> (3, Cout_p, Cin_p); tap k pairs with x[l-1+k].
        wp = jnp.pad(w.astype(f32), ((0, co_p - w.shape[0]), (0, ci_p - w.shape[1]), (0, 0)))
        return jnp.transpose(wp, (2, 0, 1)).astype(wdtype)

    w1s = split_w(w1, hid_p, cin_p)                # (3, hid_p, cin_p)
    w2s = split_w(w2, cout_p, hid_p)               # (3, cout_p, hid_p)

    def pad_affine(p, cp):
        return jnp.pad(p.astype(f32), (0, cp - p.shape[0])).reshape(cp, 1)

    g1r, b1r = pad_affine(g1, hid_p), pad_affine(b1, hid_p)
    g2r, b2r = pad_affine(g2, cout_p), pad_affine(b2, cout_p)

    # Boundary / padding masks, built once in the wrapper (hoisted out of the kernel).
    col = jnp.arange(NLp)
    l_idx = col % L
    valid = col < NL
    mm1 = (valid & (l_idx != 0)).astype(f32).reshape(1, NLp)
    mp1 = (valid & (l_idx != L - 1)).astype(f32).reshape(1, NLp)
    mval = valid.astype(f32).reshape(1, NLp)

    kernel = functools.partial(_res_block_kernel,
                               inv_cnt=1.0 / float(NL),
                               pad_cnt=float(NLp - NL))
    vmem = lambda: pl.BlockSpec(memory_space=pltpu.MemorySpace.VMEM)

    out2 = pl.pallas_call(
        kernel,
        out_shape=jax.ShapeDtypeStruct((cout_p, NLp), f32),
        in_specs=[vmem() for _ in range(10)],
        out_specs=vmem(),
    )(x2, w1s, w2s, g1r, b1r, g2r, b2r, mm1, mval, mp1)

    out = out2[:cout, :NL].reshape(cout, N, L)
    return jnp.transpose(out, (1, 0, 2))


def _reference(x, w1, w2, g1, b1, g2, b2):
    """Pure-JAX reference mirroring the PyTorch forward (training-mode BN)."""
    def conv(h, w):  # h: (N,C,L), w: (Cout,Cin,3), pad=1, stride=1
        hp = jnp.pad(h, ((0, 0), (0, 0), (1, 1)))
        return (jnp.einsum('oi,nil->nol', w[:, :, 0], hp[:, :, :-2])
                + jnp.einsum('oi,nil->nol', w[:, :, 1], hp[:, :, 1:-1])
                + jnp.einsum('oi,nil->nol', w[:, :, 2], hp[:, :, 2:]))

    def bn(h, g, b):
        m = h.mean(axis=(0, 2), keepdims=True)
        v = ((h - m) ** 2).mean(axis=(0, 2), keepdims=True)
        return (h - m) / jnp.sqrt(v + EPS) * g.reshape(1, -1, 1) + b.reshape(1, -1, 1)

    lrelu = lambda t: jnp.where(t >= 0, t, NEG_SLOPE * t)
    a1 = lrelu(bn(conv(x, w1), g1, b1))
    y = bn(conv(a1, w2), g2, b2) + x
    return lrelu(y)


if __name__ == "__main__":
    # Small shapes implied by the module: Conv1d => (batch, channels, length).
    N, IN_CH, HID_CH, OUT_CH, L = 2, 4, 8, 4, 16

    key = jax.random.PRNGKey(0)
    k_x, k_w1, k_w2, k_g1, k_b1, k_g2, k_b2 = jax.random.split(key, 7)

    x = jax.random.normal(k_x, (N, IN_CH, L), dtype=jnp.float32)
    w1 = 0.3 * jax.random.normal(k_w1, (HID_CH, IN_CH, 3), dtype=jnp.float32)
    w2 = 0.3 * jax.random.normal(k_w2, (OUT_CH, HID_CH, 3), dtype=jnp.float32)
    # Non-trivial BN affine params to exercise the gamma/beta path.
    g1 = 1.0 + 0.2 * jax.random.normal(k_g1, (HID_CH,), dtype=jnp.float32)
    b1 = 0.2 * jax.random.normal(k_b1, (HID_CH,), dtype=jnp.float32)
    g2 = 1.0 + 0.2 * jax.random.normal(k_g2, (OUT_CH,), dtype=jnp.float32)
    b2 = 0.2 * jax.random.normal(k_b2, (OUT_CH,), dtype=jnp.float32)

    out = res_basic_block(x, w1, w2, g1, b1, g2, b2)
    out = jax.block_until_ready(out)

    ref = _reference(x, w1, w2, g1, b1, g2, b2)
    assert out.shape == (N, OUT_CH, L) and out.dtype == jnp.float32
    assert jnp.allclose(out, ref, atol=1e-4, rtol=1e-4), (
        f"max abs err {jnp.max(jnp.abs(out - ref))}")

    print("KERNEL_OK")
</pallas_src>

<mosaic_0001>
module attributes {stable_mosaic.version = 11 : i64} {
  func.func @_res_block_kernel(%arg0: memref<8x128xf32, #tpu.memory_space<vmem>>, %arg1: memref<3x8x8xf32, #tpu.memory_space<vmem>>, %arg2: memref<3x8x8xf32, #tpu.memory_space<vmem>>, %arg3: memref<8x1xf32, #tpu.memory_space<vmem>>, %arg4: memref<8x1xf32, #tpu.memory_space<vmem>>, %arg5: memref<8x1xf32, #tpu.memory_space<vmem>>, %arg6: memref<8x1xf32, #tpu.memory_space<vmem>>, %arg7: memref<1x128xf32, #tpu.memory_space<vmem>>, %arg8: memref<1x128xf32, #tpu.memory_space<vmem>>, %arg9: memref<1x128xf32, #tpu.memory_space<vmem>>, %arg10: memref<8x128xf32, #tpu.memory_space<vmem>>) attributes {dimension_semantics = [], scalar_prefetch = 0 : i64, scratch_operands = 0 : i64, tpu.core_type = #tpu.core_type<tc>} {
    %c0 = arith.constant 0 : index
    %c0_0 = arith.constant 0 : index
    %0 = vector.load %arg0[%c0, %c0_0] : memref<8x128xf32, #tpu.memory_space<vmem>>, vector<8x128xf32>
    %c0_1 = arith.constant 0 : index
    %c0_2 = arith.constant 0 : index
    %1 = vector.load %arg7[%c0_1, %c0_2] : memref<1x128xf32, #tpu.memory_space<vmem>>, vector<1x128xf32>
    %c0_3 = arith.constant 0 : index
    %c0_4 = arith.constant 0 : index
    %2 = vector.load %arg8[%c0_3, %c0_4] : memref<1x128xf32, #tpu.memory_space<vmem>>, vector<1x128xf32>
    %c0_5 = arith.constant 0 : index
    %c0_6 = arith.constant 0 : index
    %3 = vector.load %arg9[%c0_5, %c0_6] : memref<1x128xf32, #tpu.memory_space<vmem>>, vector<1x128xf32>
    %c1_i32 = arith.constant 1 : i32
    %4 = tpu.dynamic_rotate %0 by %c1_i32 dim 1 : vector<8x128xf32>, i32 -> vector<8x128xf32>
    %5 = vector.broadcast %1 : vector<1x128xf32> to vector<8x128xf32>
    %6 = arith.mulf %4, %5 : vector<8x128xf32>
    %c127_i32 = arith.constant 127 : i32
    %7 = tpu.dynamic_rotate %0 by %c127_i32 dim 1 : vector<8x128xf32>, i32 -> vector<8x128xf32>
    %8 = vector.broadcast %3 : vector<1x128xf32> to vector<8x128xf32>
    %9 = arith.mulf %7, %8 : vector<8x128xf32>
    %c1 = arith.constant 1 : index
    %c0_7 = arith.constant 0 : index
    %c0_8 = arith.constant 0 : index
    %10 = vector.load %arg1[%c1, %c0_7, %c0_8] : memref<3x8x8xf32, #tpu.memory_space<vmem>>, vector<1x8x8xf32>
    %11 = vector.shape_cast %10 : vector<1x8x8xf32> to vector<8x8xf32>
    %cst = arith.constant dense<0.000000e+00> : vector<8x128xf32>
    %12 = tpu.matmul %11, %0, %cst {dimension_numbers = #tpu.dot_dimension_numbers<[1], [0], [0], [1], [0, 0, 1, 1], [], []>} : vector<8x8xf32>, vector<8x128xf32>, vector<8x128xf32> -> vector<8x128xf32>
    %c0_9 = arith.constant 0 : index
    %c0_10 = arith.constant 0 : index
    %c0_11 = arith.constant 0 : index
    %13 = vector.load %arg1[%c0_9, %c0_10, %c0_11] : memref<3x8x8xf32, #tpu.memory_space<vmem>>, vector<1x8x8xf32>
    %14 = vector.shape_cast %13 : vector<1x8x8xf32> to vector<8x8xf32>
    %cst_12 = arith.constant dense<0.000000e+00> : vector<8x128xf32>
    %15 = tpu.matmul %14, %6, %cst_12 {dimension_numbers = #tpu.dot_dimension_numbers<[1], [0], [0], [1], [0, 0, 1, 1], [], []>} : vector<8x8xf32>, vector<8x128xf32>, vector<8x128xf32> -> vector<8x128xf32>
    %16 = arith.addf %12, %15 : vector<8x128xf32>
    %c2 = arith.constant 2 : index
    %c0_13 = arith.constant 0 : index
    %c0_14 = arith.constant 0 : index
    %17 = vector.load %arg1[%c2, %c0_13, %c0_14] : memref<3x8x8xf32, #tpu.memory_space<vmem>>, vector<1x8x8xf32>
    %18 = vector.shape_cast %17 : vector<1x8x8xf32> to vector<8x8xf32>
    %cst_15 = arith.constant dense<0.000000e+00> : vector<8x128xf32>
    %19 = tpu.matmul %18, %9, %cst_15 {dimension_numbers = #tpu.dot_dimension_numbers<[1], [0], [0], [1], [0, 0, 1, 1], [], []>} : vector<8x8xf32>, vector<8x128xf32>, vector<8x128xf32> -> vector<8x128xf32>
    %20 = arith.addf %16, %19 : vector<8x128xf32>
    %c0_16 = arith.constant 0 : index
    %c0_17 = arith.constant 0 : index
    %21 = vector.load %arg3[%c0_16, %c0_17] : memref<8x1xf32, #tpu.memory_space<vmem>>, vector<8x1xf32>
    %c0_18 = arith.constant 0 : index
    %c0_19 = arith.constant 0 : index
    %22 = vector.load %arg4[%c0_18, %c0_19] : memref<8x1xf32, #tpu.memory_space<vmem>>, vector<8x1xf32>
    %cst_20 = arith.constant dense<0.000000e+00> : vector<8xf32>
    %23 = vector.multi_reduction <add>, %20, %cst_20 [1] : vector<8x128xf32> to vector<8xf32>
    %24 = vector.shape_cast %23 : vector<8xf32> to vector<8x1xf32>
    %cst_21 = arith.constant 3.125000e-02 : f32
    %25 = vector.broadcast %cst_21 : f32 to vector<8x1xf32>
    %26 = arith.mulf %24, %25 : vector<8x1xf32>
    %27 = vector.broadcast %26 : vector<8x1xf32> to vector<8x128xf32>
    %28 = arith.subf %20, %27 : vector<8x128xf32>
    %29 = arith.mulf %28, %28 : vector<8x128xf32>
    %cst_22 = arith.constant dense<0.000000e+00> : vector<8xf32>
    %30 = vector.multi_reduction <add>, %29, %cst_22 [1] : vector<8x128xf32> to vector<8xf32>
    %31 = vector.shape_cast %30 : vector<8xf32> to vector<8x1xf32>
    %32 = arith.mulf %26, %26 : vector<8x1xf32>
    %cst_23 = arith.constant 9.600000e+01 : f32
    %33 = vector.broadcast %cst_23 : f32 to vector<8x1xf32>
    %34 = arith.mulf %33, %32 : vector<8x1xf32>
    %35 = arith.subf %31, %34 : vector<8x1xf32>
    %cst_24 = arith.constant 3.125000e-02 : f32
    %36 = vector.broadcast %cst_24 : f32 to vector<8x1xf32>
    %37 = arith.mulf %35, %36 : vector<8x1xf32>
    %cst_25 = arith.constant 9.99999974E-6 : f32
    %38 = vector.broadcast %cst_25 : f32 to vector<8x1xf32>
    %39 = arith.addf %37, %38 : vector<8x1xf32>
    %40 = math.rsqrt %39 : vector<8x1xf32>
    %41 = arith.mulf %40, %21 : vector<8x1xf32>
    %42 = vector.broadcast %41 : vector<8x1xf32> to vector<8x128xf32>
    %43 = arith.mulf %28, %42 : vector<8x128xf32>
    %44 = vector.broadcast %22 : vector<8x1xf32> to vector<8x128xf32>
    %45 = arith.addf %43, %44 : vector<8x128xf32>
    %cst_26 = arith.constant 0.000000e+00 : f32
    %46 = vector.broadcast %cst_26 : f32 to vector<8x128xf32>
    %47 = arith.cmpf oge, %45, %46 : vector<8x128xf32>
    %cst_27 = arith.constant 1.000000e-01 : f32
    %48 = vector.broadcast %cst_27 : f32 to vector<8x128xf32>
    %49 = arith.mulf %48, %45 : vector<8x128xf32>
    %50 = arith.select %47, %45, %49 : vector<8x128xi1>, vector<8x128xf32>
    %51 = vector.broadcast %2 : vector<1x128xf32> to vector<8x128xf32>
    %52 = arith.mulf %50, %51 : vector<8x128xf32>
    %c1_i32_28 = arith.constant 1 : i32
    %53 = tpu.dynamic_rotate %52 by %c1_i32_28 dim 1 : vector<8x128xf32>, i32 -> vector<8x128xf32>
    %54 = vector.broadcast %1 : vector<1x128xf32> to vector<8x128xf32>
    %55 = arith.mulf %53, %54 : vector<8x128xf32>
    %c127_i32_29 = arith.constant 127 : i32
    %56 = tpu.dynamic_rotate %52 by %c127_i32_29 dim 1 : vector<8x128xf32>, i32 -> vector<8x128xf32>
    %57 = vector.broadcast %3 : vector<1x128xf32> to vector<8x128xf32>
    %58 = arith.mulf %56, %57 : vector<8x128xf32>
    %c1_30 = arith.constant 1 : index
    %c0_31 = arith.constant 0 : index
    %c0_32 = arith.constant 0 : index
    %59 = vector.load %arg2[%c1_30, %c0_31, %c0_32] : memref<3x8x8xf32, #tpu.memory_space<vmem>>, vector<1x8x8xf32>
    %60 = vector.shape_cast %59 : vector<1x8x8xf32> to vector<8x8xf32>
    %cst_33 = arith.constant dense<0.000000e+00> : vector<8x128xf32>
    %61 = tpu.matmul %60, %52, %cst_33 {dimension_numbers = #tpu.dot_dimension_numbers<[1], [0], [0], [1], [0, 0, 1, 1], [], []>} : vector<8x8xf32>, vector<8x128xf32>, vector<8x128xf32> -> vector<8x128xf32>
    %c0_34 = arith.constant 0 : index
    %c0_35 = arith.constant 0 : index
    %c0_36 = arith.constant 0 : index
    %62 = vector.load %arg2[%c0_34, %c0_35, %c0_36] : memref<3x8x8xf32, #tpu.memory_space<vmem>>, vector<1x8x8xf32>
    %63 = vector.shape_cast %62 : vector<1x8x8xf32> to vector<8x8xf32>
    %cst_37 = arith.constant dense<0.000000e+00> : vector<8x128xf32>
    %64 = tpu.matmul %63, %55, %cst_37 {dimension_numbers = #tpu.dot_dimension_numbers<[1], [0], [0], [1], [0, 0, 1, 1], [], []>} : vector<8x8xf32>, vector<8x128xf32>, vector<8x128xf32> -> vector<8x128xf32>
    %65 = arith.addf %61, %64 : vector<8x128xf32>
    %c2_38 = arith.constant 2 : index
    %c0_39 = arith.constant 0 : index
    %c0_40 = arith.constant 0 : index
    %66 = vector.load %arg2[%c2_38, %c0_39, %c0_40] : memref<3x8x8xf32, #tpu.memory_space<vmem>>, vector<1x8x8xf32>
    %67 = vector.shape_cast %66 : vector<1x8x8xf32> to vector<8x8xf32>
    %cst_41 = arith.constant dense<0.000000e+00> : vector<8x128xf32>
    %68 = tpu.matmul %67, %58, %cst_41 {dimension_numbers = #tpu.dot_dimension_numbers<[1], [0], [0], [1], [0, 0, 1, 1], [], []>} : vector<8x8xf32>, vector<8x128xf32>, vector<8x128xf32> -> vector<8x128xf32>
    %69 = arith.addf %65, %68 : vector<8x128xf32>
    %c0_42 = arith.constant 0 : index
    %c0_43 = arith.constant 0 : index
    %70 = vector.load %arg5[%c0_42, %c0_43] : memref<8x1xf32, #tpu.memory_space<vmem>>, vector<8x1xf32>
    %c0_44 = arith.constant 0 : index
    %c0_45 = arith.constant 0 : index
    %71 = vector.load %arg6[%c0_44, %c0_45] : memref<8x1xf32, #tpu.memory_space<vmem>>, vector<8x1xf32>
    %cst_46 = arith.constant dense<0.000000e+00> : vector<8xf32>
    %72 = vector.multi_reduction <add>, %69, %cst_46 [1] : vector<8x128xf32> to vector<8xf32>
    %73 = vector.shape_cast %72 : vector<8xf32> to vector<8x1xf32>
    %cst_47 = arith.constant 3.125000e-02 : f32
    %74 = vector.broadcast %cst_47 : f32 to vector<8x1xf32>
    %75 = arith.mulf %73, %74 : vector<8x1xf32>
    %76 = vector.broadcast %75 : vector<8x1xf32> to vector<8x128xf32>
    %77 = arith.subf %69, %76 : vector<8x128xf32>
    %78 = arith.mulf %77, %77 : vector<8x128xf32>
    %cst_48 = arith.constant dense<0.000000e+00> : vector<8xf32>
    %79 = vector.multi_reduction <add>, %78, %cst_48 [1] : vector<8x128xf32> to vector<8xf32>
    %80 = vector.shape_cast %79 : vector<8xf32> to vector<8x1xf32>
    %81 = arith.mulf %75, %75 : vector<8x1xf32>
    %cst_49 = arith.constant 9.600000e+01 : f32
    %82 = vector.broadcast %cst_49 : f32 to vector<8x1xf32>
    %83 = arith.mulf %82, %81 : vector<8x1xf32>
    %84 = arith.subf %80, %83 : vector<8x1xf32>
    %cst_50 = arith.constant 3.125000e-02 : f32
    %85 = vector.broadcast %cst_50 : f32 to vector<8x1xf32>
    %86 = arith.mulf %84, %85 : vector<8x1xf32>
    %cst_51 = arith.constant 9.99999974E-6 : f32
    %87 = vector.broadcast %cst_51 : f32 to vector<8x1xf32>
    %88 = arith.addf %86, %87 : vector<8x1xf32>
    %89 = math.rsqrt %88 : vector<8x1xf32>
    %90 = arith.mulf %89, %70 : vector<8x1xf32>
    %91 = vector.broadcast %90 : vector<8x1xf32> to vector<8x128xf32>
    %92 = arith.mulf %77, %91 : vector<8x128xf32>
    %93 = vector.broadcast %71 : vector<8x1xf32> to vector<8x128xf32>
    %94 = arith.addf %92, %93 : vector<8x128xf32>
    %95 = arith.addf %94, %0 : vector<8x128xf32>
    %cst_52 = arith.constant 0.000000e+00 : f32
    %96 = vector.broadcast %cst_52 : f32 to vector<8x128xf32>
    %97 = arith.cmpf oge, %95, %96 : vector<8x128xf32>
    %cst_53 = arith.constant 1.000000e-01 : f32
    %98 = vector.broadcast %cst_53 : f32 to vector<8x128xf32>
    %99 = arith.mulf %98, %95 : vector<8x128xf32>
    %100 = arith.select %97, %95, %99 : vector<8x128xi1>, vector<8x128xf32>
    %c0_54 = arith.constant 0 : index
    %c0_55 = arith.constant 0 : index
    %101 = vector.load %arg10[%c0_54, %c0_55] : memref<8x128xf32, #tpu.memory_space<vmem>>, vector<8x128xf32>
    tpu.vector_store %arg10[%c0_54, %c0_55], %100 {strides = array<i32>} : memref<8x128xf32, #tpu.memory_space<vmem>>, vector<8x128xf32>,
    return
  }
}

</mosaic_0001>

<bundles_post_ra>
// kernel: tpu_custom_call.1
= control target key start
LH: loop header
LB: loop body
LE: loop exit
PB: predicated region body
PF: predicated region fallthrough
CT: control target
= control target key end

     0   :  { %15 = vsyncpa [#allocation3], 0  ;;  %s563_s0 = inlined_call_operand.vmem [shape: f32[8,128], index: 0, kind: input, shape index: {}]   ;;  %s564_s1 = inlined_call_operand.hbm [shape: f32[3,8,8], index: 1, kind: input, shape index: {}]   ;;  %s565_s2 = inlined_call_operand.hbm [shape: f32[3,8,8], index: 2, kind: input, shape index: {}]   ;;  %s566_s3 = inlined_call_operand.vmem [shape: f32[8,1], index: 3, kind: input, shape index: {}]   ;;  %s567_s4 = inlined_call_operand.vmem [shape: f32[8,1], index: 4, kind: input, shape index: {}]   ;;  %s568_s5 = inlined_call_operand.vmem [shape: f32[8,1], index: 5, kind: input, shape index: {}]   ;;  %s569_s6 = inlined_call_operand.vmem [shape: f32[8,1], index: 6, kind: input, shape index: {}]   ;;  %s570_s7 = inlined_call_operand.vmem [shape: f32[1,128], index: 7, kind: input, shape index: {}]   ;;  %s571_s8 = inlined_call_operand.vmem [shape: f32[1,128], index: 8, kind: input, shape index: {}]   ;;  %s572_s9 = inlined_call_operand.vmem [shape: f32[1,128], index: 9, kind: input, shape index: {}]   ;;  %s573_s10 = inlined_call_operand.hbm [shape: f32[8,128], index: 10, kind: output, shape index: {}]  }
   0x1   :  { %16 = vsyncpa [#allocation6], 0 }
   0x2   :  { %17 = vsyncpa [#allocation4], 0  ;;  %s24_s15 = sshll.u32 %s564_s1, 4  ;;  %s447_s16 = smov [#allocation2]   ;;  %s25_s15 = int_to_ptr.hbm [resolvable:$true] %s24_s15 }
   0x3   :  { %s26_s17 = sshll.u32 %s447_s16, 4  ;;  %s37_s20 = sshll.u32 %s565_s2, 4  ;;  %s27_s17 = int_to_ptr.vmem [resolvable:$true] %s26_s17  ;;  %s38_s20 = int_to_ptr.hbm [resolvable:$true] %s37_s20 }
   0x4   :  { %s448_s21 = smov 128   ;;  %s449_s22 = smov 8  }
   0x5   :  { %32 = dma.hbm_to_vmem [thread:$0]  %s25_s15, 384, %s27_s17, [#allocation3], %s448_s21, %s448_s21, %s449_s22  }
   0x6   :  { %s450_s23 = smov [#allocation5]  }
   0x7   :  { %s39_s24 = sshll.u32 %s450_s23, 4  ;;  %s40_s24 = int_to_ptr.vmem [resolvable:$true] %s39_s24 }
   0x8   :  { %45 = dma.hbm_to_vmem [thread:$0]  %s38_s20, 384, %s40_s24, [#allocation6], %s448_s21, %s448_s21, %s449_s22  }
   0x9   :  { %441 = dma.done.wait [#allocation3], 384  }
   0xa   :  { %442 = vsyncadd [#allocation3], 4294966912 }
   0xb   :  { %443 = dma.done.wait [#allocation6], 384  }
   0xc   :  { %444 = vsyncadd [#allocation6], 4294966912  ;;  %v519_v0 = vld [vmem:[%s563_s0] sm:$0xff]  ;;  %s451_s26 = smov 127   ;;  %s452_s2 = smov 1   ;;  %vm87_vm0 = vcmask 64512  }
   0xd   :  { %78 = vrot.lane.b32.xlu0 %v519_v0, %s451_s26  ;;  %129 = vmatpush.msra.mxu1 %v519_v0  ;;  %v85_v1 = vld [vmem:[#allocation2 + $0x8] sm:$0xff]  ;;  %v530_v2 = vld [vmem:[%s572_s9] ss:$0 sm:$0xff]  ;;  %v135_v5 = vld [vmem:[#allocation2 + $0x10] sm:$0xff]  ;;  %v453_v19 = vmov 0   ;;  %s454_s15 = smov [#allocation7]  }
   0xe   :  { %346 = vmatmul.msk.f32.vlgmr.msra.gmra.mxu1 %vm87_vm0, %v85_v1  ;;  %v363_v6 = vld [vmem:[%s570_s7] ss:$0 sm:$0xff]  ;;  %359 = vset.pattern.permute.xlu2 %v453_v19  ;;  %v212_v49 = vld [vmem:[#allocation5] sm:$0xff]  ;;  %v260_v50 = vld [vmem:[#allocation5 + $0x10] sm:$0xff]  ;;  %s332_s16 = sshll.u32 %s454_s15, 4  ;;  %s334_s18 = sshll.u32 %s573_s10, 4  ;;  %s333_s16 = int_to_ptr.vmem [resolvable:$true] %s332_s16  ;;  %s335_s18 = int_to_ptr.hbm [resolvable:$true] %s334_s18 }
   0xf   :  { %v86_v9 = vld [vmem:[#allocation2] sm:$0xff]  ;;  %360 = vset.pattern.permute.xlu1 %v453_v19  ;;  %361 = vset.pattern.permute.xlu0 %v453_v19 }
  0x10   :  { %v160_v31 = vld [vmem:[%s566_s3] sm:$0xff] }
  0x11   :  { %v161_v35 = vld [vmem:[%s567_s4] sm:$0xff] }
  0x12   :  { %v364_v40 = vld [vmem:[%s571_s8] ss:$0 sm:$0xff] }
  0x13   :  { %v211_v44 = vld [vmem:[#allocation5 + $0x8] sm:$0xff] }
  0x15   :  { %72 = vrot.lane.b32.xlu0 %v519_v0, %s452_s2 }
  0x7f   :  { %v79_v3 = vpop.permute.xlu0 %78 }
  0x80   :  { %v83_v4 = vmul.f32 %v530_v2, %v79_v3 }
  0x82   :  { %154 = vmatpush.msra.mxu2 %v83_v4 }
  0x83   :  { %347 = vmatmul.msk.f32.vlgmr.msra.gmra.mxu2 %vm87_vm0, %v135_v5 }
  0x87   :  { %v73_v7 = vpop.permute.xlu0 %72 }
  0x88   :  { %v77_v8 = vmul.f32 %v363_v6, %v73_v7 }
  0x8a   :  { %106 = vmatpush.msra.mxu0 %v77_v8  ;;  %v285_v8 = vld [vmem:[%s568_s5] sm:$0xff] }
  0x8b   :  { %345 = vmatmul.msk.f32.vlgmr.msra.gmra.mxu0 %vm87_vm0, %v86_v9  ;;  %v131_v10 = vpop.f32.mrf.mxu1 }
 0x106   :  { %v156_v12 = vpop.f32.mrf.mxu2 }
 0x108   :  { %v108_v11 = vpop.f32.mrf.mxu0 }
 0x109   :  { %v132_v13 = vadd.f32 %v131_v10, %v108_v11 }
 0x10b   :  { %v159_v14 = vadd.f32 %v156_v12, %v132_v13  ;;  %v286_v12 = vld [vmem:[%s569_s6] sm:$0xff] }
 0x10d   :  { %162 = vadd.xlane.f32.xlu1 %v159_v14 }
 0x180   :  { %v163_v15 = vpop.xlane.xlu1 %162 }
 0x181   :  { %v164_v16 = vmul.f32 0.03125, %v163_v15 }
 0x183   :  { %v165_v17 = vsub.f32 %v159_v14, %v164_v16  ;;  %v169_v20 = vmul.f32 %v164_v16, %v164_v16 }
 0x185   :  { %v166_v18 = vmul.f32 %v165_v17, %v165_v17  ;;  %v170_v21 = vmul.f32 96.0, %v169_v20 }
 0x187   :  { %167 = vadd.xlane.f32.xlu1 %v166_v18 }
 0x1fa   :  { %v168_v22 = vpop.xlane.xlu1 %167 }
 0x1fb   :  { %v171_v23 = vsub.f32 %v168_v22, %v170_v21 }
 0x1fd   :  { %v172_v24 = vmul.f32 0.03125, %v171_v23 }
 0x1ff   :  { %v173_v25 = vadd.f32 1e-05, %v172_v24 }
 0x201   :  { %365 = vrsqrt.f32 %v173_v25  ;;  %vm180_vm2 = vweird.f32 %v173_v25 }
 0x207   :  { %v366_v26 = vpop.eup %365 }
 0x208   :  { %v175_v27 = vmul.f32 %v366_v26, %v173_v25  ;;  %vm181_vm1 = vweird.f32 %v366_v26 }
 0x209   :  { %vm182_vm3 = vmor %vm180_vm2, %vm181_vm1 }
 0x20a   :  { %v176_v28 = vmul.f32 %v366_v26, %v175_v27 }
 0x20c   :  { %v177_v29 = vmul.f32 0.5, %v176_v28 }
 0x20e   :  { %v178_v30 = vsub.f32 1.5, %v177_v29 }
 0x210   :  { %v179_v32 = vmul.f32 %v366_v26, %v178_v30 }
 0x212   :  { %v183_v33 = vsel %vm182_vm3, %v366_v26, %v179_v32 }
 0x213   :  { %v184_v34 = vmul.f32 %v183_v33, %v160_v31 }
 0x215   :  { %187 = vperm.xlu2 %359, %v184_v34  }
 0x21d   :  { %193 = vperm.xlu2 %359, %v161_v35  }
 0x26f   :  { %v188_v36 = vpop.permute.xlu2 %187 }
 0x270   :  { %v190_v37 = vmul.f32 %v188_v36, %v165_v17 }
 0x277   :  { %v194_v38 = vpop.permute.xlu2 %193 }
 0x278   :  { %v196_v39 = vadd.f32 %v194_v38, %v190_v37 }
 0x27a   :  { %vm197_vm4 = vcmp.ge.f32.partialorder %v196_v39, 0.0  ;;  %v198_v41 = vmul.f32 0.1, %v196_v39 }
 0x27c   :  { %v199_v42 = vsel %vm197_vm4, %v196_v39, %v198_v41 }
 0x27d   :  { %v203_v43 = vmul.f32 %v364_v40, %v199_v42 }
 0x27f   :  { %207 = vrot.lane.b32.xlu1 %v203_v43, %s451_s26  ;;  %204 = vrot.lane.b32.xlu0 %v203_v43, %s452_s2 }
 0x280   :  { %254 = vmatpush.msrb.mxu0 %v203_v43 }
 0x281   :  { %349 = vmatmul.msk.f32.vlgmr.msrb.gmra.mxu0 %vm87_vm0, %v211_v44 }
 0x2f1   :  { %v208_v45 = vpop.permute.xlu1 %207  ;;  %v205_v46 = vpop.permute.xlu0 %204 }
 0x2f2   :  { %v209_v47 = vmul.f32 %v530_v2, %v208_v45  ;;  %v206_v48 = vmul.f32 %v363_v6, %v205_v46 }
 0x2f4   :  { %231 = vmatpush.msra.mxu3 %v206_v48  ;;  %279 = vmatpush.msrb.mxu1 %v209_v47 }
 0x2f5   :  { %348 = vmatmul.msk.f32.vlgmr.msra.gmra.mxu3 %vm87_vm0, %v212_v49  ;;  %350 = vmatmul.msk.f32.vlgmr.msrb.gmra.mxu1 %vm87_vm0, %v260_v50 }
 0x2fe   :  { %v256_v51 = vpop.f32.mrf.mxu0 }
 0x372   :  { %v281_v53 = vpop.f32.mrf.mxu1 }
 0x378   :  { %v233_v52 = vpop.f32.mrf.mxu3 }
 0x379   :  { %v257_v54 = vadd.f32 %v256_v51, %v233_v52 }
 0x37b   :  { %v284_v55 = vadd.f32 %v281_v53, %v257_v54 }
 0x37d   :  { %287 = vadd.xlane.f32.xlu2 %v284_v55 }
 0x3f0   :  { %v288_v56 = vpop.xlane.xlu2 %287 }
 0x3f1   :  { %v289_v57 = vmul.f32 0.03125, %v288_v56 }
 0x3f3   :  { %v290_v58 = vsub.f32 %v284_v55, %v289_v57  ;;  %v294_v60 = vmul.f32 %v289_v57, %v289_v57 }
 0x3f5   :  { %v291_v59 = vmul.f32 %v290_v58, %v290_v58  ;;  %v295_v61 = vmul.f32 96.0, %v294_v60 }
 0x3f7   :  { %292 = vadd.xlane.f32.xlu0 %v291_v59 }
 0x46a   :  { %v293_v62 = vpop.xlane.xlu0 %292 }
 0x46b   :  { %v296_v63 = vsub.f32 %v293_v62, %v295_v61 }
 0x46d   :  { %v297_v1 = vmul.f32 0.03125, %v296_v63 }
 0x46f   :  { %v298_v2 = vadd.f32 1e-05, %v297_v1 }
 0x471   :  { %367 = vrsqrt.f32 %v298_v2  ;;  %vm305_vm6 = vweird.f32 %v298_v2 }
 0x477   :  { %v368_v3 = vpop.eup %367 }
 0x478   :  { %v300_v4 = vmul.f32 %v368_v3, %v298_v2  ;;  %vm306_vm5 = vweird.f32 %v368_v3 }
 0x479   :  { %vm307_vm7 = vmor %vm305_vm6, %vm306_vm5 }
 0x47a   :  { %v301_v5 = vmul.f32 %v368_v3, %v300_v4 }
 0x47c   :  { %v302_v6 = vmul.f32 0.5, %v301_v5 }
 0x47e   :  { %v303_v7 = vsub.f32 1.5, %v302_v6 }
 0x480   :  { %v304_v9 = vmul.f32 %v368_v3, %v303_v7 }
 0x482   :  { %v308_v10 = vsel %vm307_vm7, %v368_v3, %v304_v9 }
 0x483   :  { %v309_v11 = vmul.f32 %v308_v10, %v285_v8 }
 0x485   :  { %312 = vperm.xlu1 %360, %v309_v11  }
 0x48d   :  { %318 = vperm.xlu1 %360, %v286_v12  }
 0x4f7   :  { %v313_v13 = vpop.permute.xlu1 %312 }
 0x4f8   :  { %v315_v14 = vmul.f32 %v313_v13, %v290_v58 }
 0x4ff   :  { %v319_v15 = vpop.permute.xlu1 %318 }
 0x500   :  { %v321_v16 = vadd.f32 %v319_v15, %v315_v14 }
 0x502   :  { %v322_v17 = vadd.f32 %v321_v16, %v519_v0 }
 0x504   :  { %v324_v18 = vmul.f32 0.1, %v322_v17  ;;  %vm323_vm8 = vcmp.ge.f32.partialorder %v322_v17, 0.0 }
 0x506   :  { %v325_v19 = vsel %vm323_vm8, %v322_v17, %v324_v18 }
 0x507   :  { %326 = vst [vmem:[#allocation7] sm:$0xff] %v325_v19 }
 0x508   :  { %337 = dma.vmem_to_hbm [thread:$0]  %s333_s16, 128, %s335_s18, [#allocation4]  }
 0x509   :  { %445 = dma.done.wait [#allocation4], 128  }
 0x50a   :  { %446 = vsyncadd [#allocation4], 4294967168 }
 0x50b   :  { %342 = vsyncpa [#allocation3], 1 }
 0x50c   :  { %343 = vsyncpa [#allocation6], 1 }
 0x50d   :  { %344 = vsyncpa [#allocation4], 1 }

</bundles_post_ra>
